<compile_context>
chip_gen: v5e
topology: v5e:2x2
jax: 0.10.0
libtpu: 0.0.40
codegen_flags: <defaults>
</compile_context>

<pallas_src>
import functools

import jax
import jax.numpy as jnp
import numpy as np
from jax.experimental import pallas as pl
from jax.experimental.pallas import tpu as pltpu


# ----------------------------------------------------------------------------
# Python-side clause parsing (mirrors ClauseEnhancer.__init__ exactly)
# ----------------------------------------------------------------------------
def parse_clause(available_predicates, clause_string, initial_clause_weight):
    weight_string, clause_body = clause_string.split(':')
    if weight_string == '_':
        initial_weight = float(initial_clause_weight)
        fixed_weight = False
    else:
        initial_weight = float(weight_string)
        fixed_weight = True
    literals = clause_body.split(',')
    gather_indices = []
    signs = []
    for literal in literals:
        sign = 1.0
        if literal[0] == 'n':
            sign = -1.0
            literal = literal[1:]
        gather_indices.append(available_predicates.index(literal))
        signs.append(sign)
    return tuple(gather_indices), tuple(signs), initial_weight, fixed_weight


def _round_up(x, m):
    return ((x + m - 1) // m) * m


# ----------------------------------------------------------------------------
# Pallas kernel (closure over the static clause spec)
# ----------------------------------------------------------------------------
def _make_clause_kernel(gather_indices, signs, min_w, max_w):
    L = len(gather_indices)

    def kernel(w_ref, x_ref, scat_ref, delta_ref):
        # w_ref:     (1,)          scalar-prefetched clause weight (SMEM)
        # x_ref:     [P, TILE_B]   transposed ground-atom pre-activations
        # scat_ref:  [P, TILE_B]   scattered delta (output 0, transposed)
        # delta_ref: [L, TILE_B]   raw delta       (output 1, transposed)

        # clause_weight.data = clip(clause_weight, 0, 500)
        w = jnp.clip(w_ref[0], min_w, max_w)

        # Gather: L static row slices, sign applied on the VPU (no MXU).
        lits = [x_ref[pl.ds(idx, 1), :] * sign
                for idx, sign in zip(gather_indices, signs)]

        # Softmax across the L literals, element-wise over lanes (no XLU reduce).
        m = lits[0]
        for r in lits[1:]:
            m = jnp.maximum(m, r)
        exps = [jnp.exp(r - m) for r in lits]              # EUP
        denom = exps[0]
        for e in exps[1:]:
            denom = denom + e
        # Exact reciprocal: approx=True (~1e-3..1e-4 rel err) would break the
        # 1e-5 correctness tolerance for this tiny softmax.
        inv = pl.reciprocal(denom, approx=False)

        # Scatter: zero the tile, then overwrite the literal rows.
        # Sequential static writes => last write wins on a repeated predicate,
        # matching the reference `.at[..., idx].set(delta)` semantics.
        scat_ref[...] = jnp.zeros_like(scat_ref)
        for l in range(L):
            d = (signs[l] * w) * exps[l] * inv             # [1, TILE_B]
            delta_ref[pl.ds(l, 1), :] = d
            scat_ref[pl.ds(gather_indices[l], 1), :] = d

    return kernel


# ----------------------------------------------------------------------------
# Forward wrapper
# ----------------------------------------------------------------------------
def _clause_forward(ground_atoms, clause_weight, *, gather_indices, signs,
                    min_w, max_w, tile_b):
    B, P = ground_atoms.shape
    L = len(gather_indices)
    assert tile_b % 128 == 0

    # Lane-dense transposed layout: predicates on sublanes, batch on lanes.
    tb = min(tile_b, _round_up(B, 128))
    Bp = _round_up(B, tb)
    x_t = jnp.transpose(ground_atoms.astype(jnp.float32))   # [P, B]
    if Bp != B:
        x_t = jnp.pad(x_t, ((0, 0), (0, Bp - B)))

    w = jnp.reshape(clause_weight.astype(jnp.float32), (1,))

    kernel = _make_clause_kernel(gather_indices, signs, min_w, max_w)

    scat_t, delta_t = pl.pallas_call(
        kernel,
        out_shape=(jax.ShapeDtypeStruct((P, Bp), jnp.float32),
                   jax.ShapeDtypeStruct((L, Bp), jnp.float32)),
        grid_spec=pltpu.PrefetchScalarGridSpec(
            num_scalar_prefetch=1,                  # clause weight -> SMEM
            grid=(Bp // tb,),                       # pipeline over batch lanes
            in_specs=[pl.BlockSpec((P, tb), lambda i, w: (0, i))],
            out_specs=(pl.BlockSpec((P, tb), lambda i, w: (0, i)),
                       pl.BlockSpec((L, tb), lambda i, w: (0, i))),
        ),
        compiler_params=pltpu.CompilerParams(
            # Batch-grid axis is independent -> megacore-shardable (free ~2x on
            # v7x's 2 TCs); tiles are tiny so no vmem_limit override needed.
            dimension_semantics=("parallel",)),
    )(w, x_t)

    scattered = jnp.transpose(scat_t[:, :B])        # [B, P]
    delta = jnp.transpose(delta_t[:, :B])           # [B, L]
    return scattered, delta


class ClauseEnhancerPallas:
    """Pallas port of entity_typing_framework.kenn.ClauseEnhancer (forward only)."""

    def __init__(self, available_predicates, clause_string, initial_clause_weight,
                 min_weight=0.0, max_weight=500.0, tile_b=512):
        (self.gather_indices, self.signs,
         self.initial_weight, self.fixed_weight) = parse_clause(
            available_predicates, clause_string, initial_clause_weight)
        self.num_predicates = len(available_predicates)
        self.min_weight = float(min_weight)
        self.max_weight = float(max_weight)
        # "parameter"
        self.clause_weight = jnp.asarray(self.initial_weight, dtype=jnp.float32)
        # Constants are baked once here (no per-call numpy / one-hot building).
        self._forward = jax.jit(functools.partial(
            _clause_forward,
            gather_indices=self.gather_indices,
            signs=self.signs,
            min_w=self.min_weight,
            max_w=self.max_weight,
            tile_b=int(tile_b)))

    def __call__(self, ground_atoms):
        return self._forward(ground_atoms, self.clause_weight)


# ----------------------------------------------------------------------------
# Reference (plain JAX) for sanity checking
# ----------------------------------------------------------------------------
def reference_forward(ground_atoms, clause_weight, gather_indices, signs):
    w = jnp.clip(jnp.asarray(clause_weight, jnp.float32), 0.0, 500.0)
    selected = ground_atoms[..., gather_indices]
    clause_matrix = selected * signs
    delta = signs * jax.nn.softmax(clause_matrix, axis=-1) * w
    scattered = jnp.zeros_like(ground_atoms).at[..., gather_indices].set(delta)
    return scattered, delta


if __name__ == "__main__":
    # 16 available predicates, clause "_:nDog,Animal,nCat" with learned weight.
    available_predicates = [f"P{i}" for i in range(13)] + ["Dog", "Animal", "Cat"]
    clause_string = "_:nDog,Animal,nCat"
    initial_clause_weight = 0.5

    P = len(available_predicates)   # 16
    key = jax.random.PRNGKey(0)

    # --- small test (B=8, single grid step) ---------------------------------
    enhancer = ClauseEnhancerPallas(available_predicates, clause_string,
                                    initial_clause_weight)
    B = 8
    ground_atoms = jax.random.normal(key, (B, P), dtype=jnp.float32)

    scattered, delta = enhancer(ground_atoms)
    jax.block_until_ready((scattered, delta))

    g_idx = jnp.asarray(enhancer.gather_indices)
    g_sgn = jnp.asarray(enhancer.signs, dtype=jnp.float32)
    ref_scat, ref_delta = reference_forward(ground_atoms, enhancer.clause_weight,
                                            g_idx, g_sgn)
    np.testing.assert_allclose(np.asarray(scattered), np.asarray(ref_scat),
                               rtol=1e-5, atol=1e-5)
    np.testing.assert_allclose(np.asarray(delta), np.asarray(ref_delta),
                               rtol=1e-5, atol=1e-5)

    # --- larger test (B=1024, tile_b=256 -> 4 pipelined grid steps) ---------
    enhancer_big = ClauseEnhancerPallas(available_predicates, clause_string,
                                        initial_clause_weight, tile_b=256)
    B2 = 1024
    ground_atoms2 = jax.random.normal(jax.random.PRNGKey(1), (B2, P),
                                      dtype=jnp.float32)
    scattered2, delta2 = enhancer_big(ground_atoms2)
    jax.block_until_ready((scattered2, delta2))
    ref_scat2, ref_delta2 = reference_forward(ground_atoms2,
                                              enhancer_big.clause_weight,
                                              g_idx, g_sgn)
    np.testing.assert_allclose(np.asarray(scattered2), np.asarray(ref_scat2),
                               rtol=1e-5, atol=1e-5)
    np.testing.assert_allclose(np.asarray(delta2), np.asarray(ref_delta2),
                               rtol=1e-5, atol=1e-5)

    print("KERNEL_OK")
</pallas_src>

<mosaic_0001>
module attributes {stable_mosaic.version = 11 : i64} {
  func.func @kernel(%arg0: i32, %arg1: memref<1xf32, #tpu.memory_space<smem>>, %arg2: memref<16x128xf32, #tpu.memory_space<vmem>>, %arg3: memref<16x128xf32, #tpu.memory_space<vmem>>, %arg4: memref<3x128xf32, #tpu.memory_space<vmem>>) attributes {dimension_semantics = [#tpu.dimension_semantics<parallel>], iteration_bounds = array<i64: 1>, scalar_prefetch = 1 : i64, scratch_operands = 0 : i64, tpu.core_type = #tpu.core_type<tc>, window_params = [{transform_indices = @transform_0, window_bounds = array<i64: 16, 128>}, {transform_indices = @transform_1, window_bounds = array<i64: 16, 128>}, {transform_indices = @transform_2, window_bounds = array<i64: 3, 128>}]} {
    %c0 = arith.constant 0 : index
    %0 = memref.load %arg1[%c0] : memref<1xf32, #tpu.memory_space<smem>>
    %cst = arith.constant 0.000000e+00 : f32
    %cst_0 = arith.constant 5.000000e+02 : f32
    %1 = arith.maximumf %cst, %0 : f32
    %2 = arith.minimumf %cst_0, %1 : f32
    %c13 = arith.constant 13 : index
    %c0_1 = arith.constant 0 : index
    %3 = vector.load %arg2[%c13, %c0_1] : memref<16x128xf32, #tpu.memory_space<vmem>>, vector<1x128xf32>
    %cst_2 = arith.constant -1.000000e+00 : f32
    %4 = vector.broadcast %cst_2 : f32 to vector<1x128xf32>
    %5 = arith.mulf %3, %4 : vector<1x128xf32>
    %c14 = arith.constant 14 : index
    %c0_3 = arith.constant 0 : index
    %6 = vector.load %arg2[%c14, %c0_3] : memref<16x128xf32, #tpu.memory_space<vmem>>, vector<1x128xf32>
    %cst_4 = arith.constant 1.000000e+00 : f32
    %7 = vector.broadcast %cst_4 : f32 to vector<1x128xf32>
    %8 = arith.mulf %6, %7 : vector<1x128xf32>
    %c15 = arith.constant 15 : index
    %c0_5 = arith.constant 0 : index
    %9 = vector.load %arg2[%c15, %c0_5] : memref<16x128xf32, #tpu.memory_space<vmem>>, vector<1x128xf32>
    %cst_6 = arith.constant -1.000000e+00 : f32
    %10 = vector.broadcast %cst_6 : f32 to vector<1x128xf32>
    %11 = arith.mulf %9, %10 : vector<1x128xf32>
    %12 = arith.maximumf %5, %8 : vector<1x128xf32>
    %13 = arith.maximumf %12, %11 : vector<1x128xf32>
    %14 = arith.subf %5, %13 : vector<1x128xf32>
    %15 = math.exp %14 : vector<1x128xf32>
    %16 = arith.subf %8, %13 : vector<1x128xf32>
    %17 = math.exp %16 : vector<1x128xf32>
    %18 = arith.subf %11, %13 : vector<1x128xf32>
    %19 = math.exp %18 : vector<1x128xf32>
    %20 = arith.addf %15, %17 : vector<1x128xf32>
    %21 = arith.addf %20, %19 : vector<1x128xf32>
    %22 = tpu.reciprocal %21 : vector<1x128xf32> -> vector<1x128xf32>
    %cst_7 = arith.constant 0.000000e+00 : f32
    %23 = vector.broadcast %cst_7 : f32 to vector<16x128xf32>
    %c0_8 = arith.constant 0 : index
    %c0_9 = arith.constant 0 : index
    %24 = vector.load %arg3[%c0_8, %c0_9] : memref<16x128xf32, #tpu.memory_space<vmem>>, vector<16x128xf32>
    tpu.vector_store %arg3[%c0_8, %c0_9], %23 {strides = array<i32>} : memref<16x128xf32, #tpu.memory_space<vmem>>, vector<16x128xf32>,
    %cst_10 = arith.constant -1.000000e+00 : f32
    %25 = arith.mulf %cst_10, %2 : f32
    %26 = vector.broadcast %25 : f32 to vector<1x128xf32>
    %27 = arith.mulf %26, %15 : vector<1x128xf32>
    %28 = arith.mulf %27, %22 : vector<1x128xf32>
    %c0_11 = arith.constant 0 : index
    %c0_12 = arith.constant 0 : index
    %29 = vector.load %arg4[%c0_11, %c0_12] : memref<3x128xf32, #tpu.memory_space<vmem>>, vector<1x128xf32>
    tpu.vector_store %arg4[%c0_11, %c0_12], %28 {strides = array<i32>} : memref<3x128xf32, #tpu.memory_space<vmem>>, vector<1x128xf32>,
    %c13_13 = arith.constant 13 : index
    %c0_14 = arith.constant 0 : index
    %30 = vector.load %arg3[%c13_13, %c0_14] : memref<16x128xf32, #tpu.memory_space<vmem>>, vector<1x128xf32>
    tpu.vector_store %arg3[%c13_13, %c0_14], %28 {strides = array<i32>} : memref<16x128xf32, #tpu.memory_space<vmem>>, vector<1x128xf32>,
    %cst_15 = arith.constant 1.000000e+00 : f32
    %31 = arith.mulf %cst_15, %2 : f32
    %32 = vector.broadcast %31 : f32 to vector<1x128xf32>
    %33 = arith.mulf %32, %17 : vector<1x128xf32>
    %34 = arith.mulf %33, %22 : vector<1x128xf32>
    %c1 = arith.constant 1 : index
    %c0_16 = arith.constant 0 : index
    %35 = vector.load %arg4[%c1, %c0_16] : memref<3x128xf32, #tpu.memory_space<vmem>>, vector<1x128xf32>
    tpu.vector_store %arg4[%c1, %c0_16], %34 {strides = array<i32>} : memref<3x128xf32, #tpu.memory_space<vmem>>, vector<1x128xf32>,
    %c14_17 = arith.constant 14 : index
    %c0_18 = arith.constant 0 : index
    %36 = vector.load %arg3[%c14_17, %c0_18] : memref<16x128xf32, #tpu.memory_space<vmem>>, vector<1x128xf32>
    tpu.vector_store %arg3[%c14_17, %c0_18], %34 {strides = array<i32>} : memref<16x128xf32, #tpu.memory_space<vmem>>, vector<1x128xf32>,
    %cst_19 = arith.constant -1.000000e+00 : f32
    %37 = arith.mulf %cst_19, %2 : f32
    %38 = vector.broadcast %37 : f32 to vector<1x128xf32>
    %39 = arith.mulf %38, %19 : vector<1x128xf32>
    %40 = arith.mulf %39, %22 : vector<1x128xf32>
    %c2 = arith.constant 2 : index
    %c0_20 = arith.constant 0 : index
    %41 = vector.load %arg4[%c2, %c0_20] : memref<3x128xf32, #tpu.memory_space<vmem>>, vector<1x128xf32>
    tpu.vector_store %arg4[%c2, %c0_20], %40 {strides = array<i32>} : memref<3x128xf32, #tpu.memory_space<vmem>>, vector<1x128xf32>,
    %c15_21 = arith.constant 15 : index
    %c0_22 = arith.constant 0 : index
    %42 = vector.load %arg3[%c15_21, %c0_22] : memref<16x128xf32, #tpu.memory_space<vmem>>, vector<1x128xf32>
    tpu.vector_store %arg3[%c15_21, %c0_22], %40 {strides = array<i32>} : memref<16x128xf32, #tpu.memory_space<vmem>>, vector<1x128xf32>,
    return
  }
  func.func @transform_0(%arg0: i32, %arg1: memref<1xf32, #tpu.memory_space<smem>>) -> (i32, i32) {
    %c0_i32 = arith.constant 0 : i32
    %c0_i32_0 = arith.constant 0 : i32
    return %c0_i32, %arg0 : i32, i32
  }
  func.func @transform_1(%arg0: i32, %arg1: memref<1xf32, #tpu.memory_space<smem>>) -> (i32, i32) {
    %c0_i32 = arith.constant 0 : i32
    %c0_i32_0 = arith.constant 0 : i32
    return %c0_i32, %arg0 : i32, i32
  }
  func.func @transform_2(%arg0: i32, %arg1: memref<1xf32, #tpu.memory_space<smem>>) -> (i32, i32) {
    %c0_i32 = arith.constant 0 : i32
    %c0_i32_0 = arith.constant 0 : i32
    return %c0_i32, %arg0 : i32, i32
  }
}

</mosaic_0001>

<bundles_post_ra>
// kernel: _clause_forward.1
= control target key start
LH: loop header
LB: loop body
LE: loop exit
PB: predicated region body
PF: predicated region fallthrough
CT: control target
= control target key end

     0   :  { %v83_v0 = vmov 0.0   ;;  %s84_s22 = smov 0.0   ;;  %s85_s25 = smov 500.0   ;;  %s142_s2 = inlined_call_operand.vmem [shape: f32[16,128], index: 2, kind: output, shape index: {0}]   ;;  %s143_s1 = inlined_call_operand.vmem [shape: f32[16,128], index: 1, kind: input, shape index: {}]   ;;  %s144_s0 = inlined_call_operand.<no memory space> [shape: f32[1], index: 0, kind: input, shape index: {}]   ;;  %s145_s3 = inlined_call_operand.vmem [shape: f32[3,128], index: 3, kind: output, shape index: {1}]  }
   0x1   :  { %48 = vst [vmem:[%s142_s2 + $0x8] sm:$0xff] %v83_v0  ;;  %v15_v1 = vld [vmem:[%s143_s1 + $0xd] sm:$0x1]  ;;  %v17_v2 = vld [vmem:[%s143_s1 + $0xe] sm:$0x1]  ;;  %s13_s24 = smax.f32 %s84_s22, %s144_s0 }
   0x2   :  { %47 = vst [vmem:[%s142_s2] sm:$0xff] %v83_v0  ;;  %v16_v3 = vmul.f32 -1.0, %v15_v1  ;;  %v18_v4 = vld [vmem:[%s143_s1 + $0xf] sm:$0x1]  ;;  %s14_s26 = smin.f32 %s85_s25, %s13_s24 }
   0x3   :  { %v19_v5 = vmul.f32 -1.0, %v18_v4  ;;  %s49_s27 = smul.f32 -1.0, %s14_s26  ;;  %v55_v25 = vstv %s14_s26 }
   0x4   :  { %v20_v6 = vmax.f32 %v16_v3, %v17_v2 }
   0x5   :  { %v50_v24 = vstv %s49_s27 }
   0x6   :  { %v21_v7 = vmax.f32 %v20_v6, %v19_v5 }
   0x8   :  { %v22_v8 = vsub.f32 %v16_v3, %v21_v7  ;;  %v25_v9 = vsub.f32 %v17_v2, %v21_v7  ;;  %v28_v10 = vsub.f32 %v19_v5, %v21_v7 }
   0xa   :  { %v23_v11 = vmul.f32 1.442695, %v22_v8  ;;  %v26_v12 = vmul.f32 1.442695, %v25_v9  ;;  %v29_v13 = vmul.f32 1.442695, %v28_v10 }
   0xc   :  { %75 = vpow2.f32 %v23_v11 }
   0xd   :  { %77 = vpow2.f32 %v26_v12 }
   0xe   :  { %79 = vpow2.f32 %v29_v13 }
  0x12   :  { %v76_v14 = vpop.eup %75 }
  0x13   :  { %v78_v15 = vpop.eup %77  ;;  %v51_v29 = vmul.f32 %v76_v14, %v50_v24 }
  0x14   :  { %v80_v16 = vpop.eup %79  ;;  %v31_v17 = vadd.f32 %v78_v15, %v76_v14  ;;  %v56_v30 = vmul.f32 %v78_v15, %v55_v25 }
  0x15   :  { %v60_v32 = vmul.f32 %v80_v16, %v50_v24 }
  0x16   :  { %v32_v18 = vadd.f32 %v80_v16, %v31_v17 }
  0x18   :  { %81 = vrcp.f32 %v32_v18  ;;  %v44_v21 = vand.u32 2147483648, %v32_v18  ;;  %vm38_vm0 = vweird.f32 %v32_v18  ;;  %v42_v23 = vand.u32 2147483647, %v32_v18 }
  0x1a   :  { %v45_v27 = vor.u32 1.1754944e-38, %v44_v21  ;;  %vm43_vm3 = vcmp.eq.f32.partialorder %v42_v23, 8.507059e+37 }
  0x1e   :  { %v82_v19 = vpop.eup %81 }
  0x1f   :  { %v34_v20 = vmul.f32 %v82_v19, %v32_v18  ;;  %vm39_vm1 = vweird.f32 %v82_v19 }
  0x20   :  { %vm40_vm2 = vmor %vm38_vm0, %vm39_vm1 }
  0x21   :  { %v35_v22 = vsub.f32 1.0, %v34_v20 }
  0x23   :  { %v36_v26 = vmul.f32 %v82_v19, %v35_v22 }
  0x25   :  { %v37_v28 = vadd.f32 %v82_v19, %v36_v26 }
  0x27   :  { %v41_v31 = vsel %vm40_vm2, %v82_v19, %v37_v28 }
  0x28   :  { %v46_v33 = vsel %vm43_vm3, %v45_v27, %v41_v31 }
  0x29   :  { %v52_v34 = vmul.f32 %v51_v29, %v46_v33  ;;  %v57_v35 = vmul.f32 %v56_v30, %v46_v33  ;;  %v61_v36 = vmul.f32 %v60_v32, %v46_v33 }
  0x2b   :  { %53 = vst [vmem:[%s145_s3] sm:$0x1] %v52_v34 }
  0x2c   :  { %54 = vst [vmem:[%s142_s2 + $0xd] sm:$0x1] %v52_v34 }
  0x2d   :  { %58 = vst [vmem:[%s145_s3 + $0x1] sm:$0x1] %v57_v35 }
  0x2e   :  { %59 = vst [vmem:[%s142_s2 + $0xe] sm:$0x1] %v57_v35 }
  0x2f   :  { %62 = vst [vmem:[%s145_s3 + $0x2] sm:$0x1] %v61_v36 }
  0x30   :  { %63 = vst [vmem:[%s142_s2 + $0xf] sm:$0x1] %v61_v36 }

</bundles_post_ra>
